<compile_context>
chip_gen: v6e
topology: v6e:2x2x1
jax: 0.10.0
libtpu: 0.0.40
codegen_flags: <defaults>
</compile_context>

<pallas_src>
import jax
import jax.numpy as jnp
from jax.experimental import pallas as pl
from jax.experimental.pallas import tpu as pltpu


def _round_up(v, m):
    return (v + m - 1) // m * m


# ----------------------------- Pallas kernels -----------------------------

def _qgemm_fullk_kernel(p_ref, w_ref, sb_ref, o_ref):
    """Full-K quantized GEMM tile with fused dequant + bias.

    p_ref : (tm, K)  bf16 — zero-point-centered quantized activations (exact ints)
    w_ref : (K, tn)  bf16 — symmetric per-channel quantized weights (exact ints)
    sb_ref: (2, tn)  f32  — row 0 = a_scale*w_scale[o], row 1 = bias[o]
    o_ref : (tm, tn) f32
    """
    acc = jnp.dot(p_ref[...], w_ref[...], preferred_element_type=jnp.float32)
    o_ref[...] = sb_ref[0:1, :] * acc + sb_ref[1:2, :]


def _qgemm_kgrid_kernel(p_ref, w_ref, sb_ref, o_ref):
    """K-reduction-grid variant: accumulate directly into the resident f32
    output block (no scratch), apply scale/bias in place on the last k step."""
    k = pl.program_id(2)
    part = jnp.dot(p_ref[...], w_ref[...], preferred_element_type=jnp.float32)

    @pl.when(k == 0)
    def _():
        o_ref[...] = part

    @pl.when(k != 0)
    def _():
        o_ref[...] = o_ref[...] + part

    @pl.when(k == pl.num_programs(2) - 1)
    def _():
        o_ref[...] = sb_ref[0:1, :] * o_ref[...] + sb_ref[1:2, :]


# ----------------------------- GEMM wrapper -----------------------------

_VMEM_BUDGET = 40 * 1024 * 1024   # keep well under v7x's 64 MiB physical VMEM


def _buffers_bytes(tm, tn, tk):
    # double-buffered bf16 patch/weight tiles + f32 scale-bias + f32 output tile
    return 2 * (tm * tk * 2 + tk * tn * 2 + 2 * tn * 4 + tm * tn * 4)


def _pick_tiles(M, K_pad, O_pad):
    tn = min(512, O_pad)                                   # multiple of 128 (>=256 when possible)
    tm = 512 if M >= 512 else max(_round_up(M, 16), 16)
    tk = K_pad if K_pad <= 4096 else 2048                  # full-K when it fits comfortably

    while _buffers_bytes(tm, tn, tk) > _VMEM_BUDGET and tk > 512:
        tk = max(512, tk // 2)
    while _buffers_bytes(tm, tn, tk) > _VMEM_BUDGET and tm > 128:
        tm = max(128, _round_up(tm // 2, 16))

    # keep >= 2 parallel (M, O) grid points so both v7x TensorCores get work
    m_blocks = -(-M // tm)
    o_blocks = O_pad // tn
    if m_blocks * o_blocks < 2 and tm >= 256:
        tm = max(128, _round_up(tm // 2, 16))
    return tm, tn, tk


def quantized_gemm(patches, w_mat, scale_vec, bias_vec):
    """patches: (M, K) bf16, w_mat: (K, O) bf16, scale_vec/bias_vec: (O,) f32."""
    M, K = patches.shape
    _, O = w_mat.shape

    K_pad = _round_up(K, 128)
    O_pad = _round_up(O, 128)
    tm, tn, tk = _pick_tiles(M, K_pad, O_pad)
    M_pad = _round_up(M, tm)
    K_pad = _round_up(K_pad, tk)
    O_pad = _round_up(O_pad, tn)

    patches_p = jnp.pad(patches, ((0, M_pad - M), (0, K_pad - K)))
    w_p = jnp.pad(w_mat, ((0, K_pad - K), (0, O_pad - O)))
    sb = jnp.stack(
        [jnp.pad(scale_vec.astype(jnp.float32), (0, O_pad - O)),
         jnp.pad(bias_vec.astype(jnp.float32), (0, O_pad - O))],
        axis=0)                                                       # (2, O_pad)

    k_steps = K_pad // tk
    vmem_limit = int(min(max(_buffers_bytes(tm, tn, tk) + (4 << 20), 16 << 20),
                         56 << 20))

    if k_steps == 1:
        grid = (M_pad // tm, O_pad // tn)
        in_specs = [
            pl.BlockSpec((tm, K_pad), lambda i, j: (i, 0)),   # full-K patch strip
            pl.BlockSpec((K_pad, tn), lambda i, j: (0, j)),   # full-K weight strip
            pl.BlockSpec((2, tn), lambda i, j: (0, j)),       # scale+bias
        ]
        out_specs = pl.BlockSpec((tm, tn), lambda i, j: (i, j))
        kernel = _qgemm_fullk_kernel
        dims = ("parallel", "parallel")
    else:
        grid = (M_pad // tm, O_pad // tn, k_steps)
        in_specs = [
            pl.BlockSpec((tm, tk), lambda i, j, k: (i, k)),
            pl.BlockSpec((tk, tn), lambda i, j, k: (k, j)),
            pl.BlockSpec((2, tn), lambda i, j, k: (0, j)),
        ]
        out_specs = pl.BlockSpec((tm, tn), lambda i, j, k: (i, j))
        kernel = _qgemm_kgrid_kernel
        dims = ("parallel", "parallel", "arbitrary")

    out = pl.pallas_call(
        kernel,
        out_shape=jax.ShapeDtypeStruct((M_pad, O_pad), jnp.float32),
        grid_spec=pltpu.PrefetchScalarGridSpec(
            num_scalar_prefetch=0,
            grid=grid,
            in_specs=in_specs,
            out_specs=out_specs,
        ),
        compiler_params=pltpu.CompilerParams(
            dimension_semantics=dims,
            vmem_limit_bytes=vmem_limit,
        ),
    )(patches_p, w_p, sb)

    return out[:M, :O]


# ----------------------------- plain-JAX glue -----------------------------

def _im2col_nhwc(x_nhwc, kh, kw, stride, padding):
    """NHWC -> (N*OH*OW, Kh*Kw*Cin) patch matrix, channels minor.

    Channels are already the minor axis, so the final reshape is layout-
    preserving: no full (M, K) transpose / extra HBM round trip (XLA fuses
    the slicing into one gather-style write of the patch matrix)."""
    n, h, w, c = x_nhwc.shape
    xp = jnp.pad(x_nhwc, ((0, 0), (padding, padding), (padding, padding), (0, 0)))
    oh = (h + 2 * padding - kh) // stride + 1
    ow = (w + 2 * padding - kw) // stride + 1
    cols = []
    for i in range(kh):
        for j in range(kw):
            cols.append(xp[:, i:i + stride * oh:stride, j:j + stride * ow:stride, :])
    pats = jnp.stack(cols, axis=3).reshape(n * oh * ow, kh * kw * c)
    return pats, oh, ow


def quantized_conv2d_forward(x, weight, bias, stride, padding):
    """Forward pass of QuantizedConv2d after quantize_weights() was called."""
    O, Cin, Kh, Kw = weight.shape

    # --- weight quantizer: symmetric, per-output-channel, int8 ---
    w_flat = weight.reshape(O, -1)
    abs_max = jnp.maximum(jnp.abs(w_flat.min(axis=1)), jnp.abs(w_flat.max(axis=1)))
    w_scale = abs_max / 127.0
    safe_ws = jnp.where(w_scale == 0.0, 1.0, w_scale)
    q_w = jnp.clip(jnp.round(weight / safe_ws[:, None, None, None]), -128.0, 127.0)

    # --- activation quantizer: asymmetric, per-tensor (calibrated on x) ---
    xf = x.astype(jnp.float32)
    xmin = jnp.min(xf)
    xmax = jnp.max(xf)
    a_scale = (xmax - xmin) / 255.0
    safe_as = jnp.where(a_scale == 0.0, 1.0, a_scale)
    a_zp = jnp.clip(jnp.round(-128.0 - xmin / safe_as), -128.0, 127.0)

    # Fake-quant in the integer domain, zero-point-centered, on the NHWC tensor:
    #   x_dq = (clip(round(x/s + zp)) - zp) * s = c_x * s,  c_x integer in [-255, 255]
    # c_x is exactly representable in bf16 and c_x == 0 <=> x_dq == 0, so plain
    # zero spatial padding in im2col stays exact (no zero-point correction term).
    # The f32 accumulation of c_x*q_w products is bit-exact while partial sums
    # stay below 2^24 (K = Cin*Kh*Kw up to ~512); beyond that it rounds, which
    # is still at least as accurate as the f32 reference conv.
    x_nhwc = xf.transpose(0, 2, 3, 1)
    q_x = jnp.clip(jnp.round(x_nhwc / safe_as + a_zp), -128.0, 127.0)
    c_x = (q_x - a_zp).astype(jnp.bfloat16)

    patches, oh, ow = _im2col_nhwc(c_x, Kh, Kw, stride, padding)

    # Weight K ordering matches the patches' (kh, kw, cin); the transpose is on
    # the tiny weight tensor, not the big patch matrix.
    w_mat = q_w.astype(jnp.bfloat16).transpose(2, 3, 1, 0).reshape(Kh * Kw * Cin, O)
    comb_scale = (a_scale * w_scale).astype(jnp.float32)               # (O,)
    bias_vec = (bias.astype(jnp.float32) if bias is not None
                else jnp.zeros((O,), jnp.float32))

    out_mat = quantized_gemm(patches, w_mat, comb_scale, bias_vec)      # (M, O) f32

    n = x.shape[0]
    return out_mat.reshape(n, oh, ow, O).transpose(0, 3, 1, 2)          # NCHW


# ----------------------------- demo -----------------------------

if __name__ == "__main__":
    # Small shapes consistent with the module: N=2, Cin=4, H=W=16, Cout=8, k=3.
    N, Cin, H, W = 2, 4, 16, 16
    Cout, Ksz, stride, padding = 8, 3, 1, 1

    key = jax.random.PRNGKey(0)
    kw_, kb_, kx_ = jax.random.split(key, 3)
    weight = jax.random.normal(kw_, (Cout, Cin, Ksz, Ksz), jnp.float32)
    bias = jax.random.normal(kb_, (Cout,), jnp.float32)
    x = jax.random.normal(kx_, (N, Cin, H, W), jnp.float32)

    out = quantized_conv2d_forward(x, weight, bias, stride, padding)
    out = jax.block_until_ready(out)
    assert out.shape == (N, Cout, H, W), out.shape

    # Pure-JAX reference of the same fake-quant conv.
    w_flat = weight.reshape(Cout, -1)
    abs_max = jnp.maximum(jnp.abs(w_flat.min(axis=1)), jnp.abs(w_flat.max(axis=1)))
    w_scale = abs_max / 127.0
    q_w = jnp.clip(jnp.round(weight / w_scale[:, None, None, None]), -128, 127)
    w_dq = q_w * w_scale[:, None, None, None]
    xmin, xmax = jnp.min(x), jnp.max(x)
    a_scale = (xmax - xmin) / 255.0
    a_zp = jnp.clip(jnp.round(-128.0 - xmin / a_scale), -128, 127)
    x_dq = (jnp.clip(jnp.round(x / a_scale + a_zp), -128, 127) - a_zp) * a_scale
    ref = jax.lax.conv_general_dilated(
        x_dq, w_dq, (stride, stride), [(padding, padding)] * 2,
        dimension_numbers=("NCHW", "OIHW", "NCHW"),
        precision=jax.lax.Precision.HIGHEST,
    ) + bias[None, :, None, None]
    max_err = float(jnp.max(jnp.abs(out - ref)))
    assert jnp.allclose(out, ref, atol=1e-2, rtol=1e-3), max_err

    print("KERNEL_OK")
</pallas_src>

<mosaic_0001>
module attributes {stable_mosaic.version = 11 : i64} {
  func.func @_qgemm_fullk_kernel(%arg0: i32, %arg1: i32, %arg2: memref<256x128xbf16, #tpu.memory_space<vmem>>, %arg3: memref<128x128xbf16, #tpu.memory_space<vmem>>, %arg4: memref<2x128xf32, #tpu.memory_space<vmem>>, %arg5: memref<256x128xf32, #tpu.memory_space<vmem>>) attributes {dimension_semantics = [#tpu.dimension_semantics<parallel>, #tpu.dimension_semantics<parallel>], iteration_bounds = array<i64: 2, 1>, scalar_prefetch = 0 : i64, scratch_operands = 0 : i64, tpu.core_type = #tpu.core_type<tc>, window_params = [{transform_indices = @transform_0, window_bounds = array<i64: 256, 128>}, {transform_indices = @transform_1, window_bounds = array<i64: 128, 128>}, {transform_indices = @transform_2, window_bounds = array<i64: 2, 128>}, {transform_indices = @transform_3, window_bounds = array<i64: 256, 128>}]} {
    %c0 = arith.constant 0 : index
    %c0_0 = arith.constant 0 : index
    %0 = vector.load %arg2[%c0, %c0_0] : memref<256x128xbf16, #tpu.memory_space<vmem>>, vector<256x128xbf16>
    %c0_1 = arith.constant 0 : index
    %c0_2 = arith.constant 0 : index
    %1 = vector.load %arg3[%c0_1, %c0_2] : memref<128x128xbf16, #tpu.memory_space<vmem>>, vector<128x128xbf16>
    %cst = arith.constant dense<0.000000e+00> : vector<256x128xf32>
    %2 = tpu.matmul %0, %1, %cst {dimension_numbers = #tpu.dot_dimension_numbers<[1], [0], [0], [1], [0, 0, 1, 1], [], []>} : vector<256x128xbf16>, vector<128x128xbf16>, vector<256x128xf32> -> vector<256x128xf32>
    %c0_3 = arith.constant 0 : index
    %c0_4 = arith.constant 0 : index
    %3 = vector.load %arg4[%c0_3, %c0_4] : memref<2x128xf32, #tpu.memory_space<vmem>>, vector<1x128xf32>
    %4 = vector.broadcast %3 : vector<1x128xf32> to vector<256x128xf32>
    %5 = arith.mulf %4, %2 : vector<256x128xf32>
    %c1 = arith.constant 1 : index
    %c0_5 = arith.constant 0 : index
    %6 = vector.load %arg4[%c1, %c0_5] : memref<2x128xf32, #tpu.memory_space<vmem>>, vector<1x128xf32>
    %7 = vector.broadcast %6 : vector<1x128xf32> to vector<256x128xf32>
    %8 = arith.addf %5, %7 : vector<256x128xf32>
    %c0_6 = arith.constant 0 : index
    %c0_7 = arith.constant 0 : index
    %9 = vector.load %arg5[%c0_6, %c0_7] : memref<256x128xf32, #tpu.memory_space<vmem>>, vector<256x128xf32>
    tpu.vector_store %arg5[%c0_6, %c0_7], %8 {strides = array<i32>} : memref<256x128xf32, #tpu.memory_space<vmem>>, vector<256x128xf32>,
    return
  }
  func.func @transform_0(%arg0: i32, %arg1: i32) -> (i32, i32) {
    %c0_i32 = arith.constant 0 : i32
    %c0_i32_0 = arith.constant 0 : i32
    return %arg0, %c0_i32 : i32, i32
  }
  func.func @transform_1(%arg0: i32, %arg1: i32) -> (i32, i32) {
    %c0_i32 = arith.constant 0 : i32
    %c0_i32_0 = arith.constant 0 : i32
    return %c0_i32, %arg1 : i32, i32
  }
  func.func @transform_2(%arg0: i32, %arg1: i32) -> (i32, i32) {
    %c0_i32 = arith.constant 0 : i32
    %c0_i32_0 = arith.constant 0 : i32
    return %c0_i32, %arg1 : i32, i32
  }
  func.func @transform_3(%arg0: i32, %arg1: i32) -> (i32, i32) {
    %c0_i32 = arith.constant 0 : i32
    return %arg0, %arg1 : i32, i32
  }
}

</mosaic_0001>

<bundles_post_ra>
// kernel: tpu_custom_call.1
= control target key start
LH: loop header
LB: loop body
LE: loop exit
PB: predicated region body
PF: predicated region fallthrough
CT: control target
= control target key end

     0   :  { %8 = vsyncpa [#allocation3], 0  ;;  %s1546_s0 = inlined_call_operand.hbm [shape: bf16[512,128], index: 0, kind: input, shape index: {}]   ;;  %s1547_s1 = inlined_call_operand.hbm [shape: bf16[128,128], index: 1, kind: input, shape index: {}]   ;;  %s1548_s2 = inlined_call_operand.vmem [shape: f32[2,128], index: 2, kind: input, shape index: {}]   ;;  %s1549_s3 = inlined_call_operand.hbm [shape: f32[512,128], index: 3, kind: output, shape index: {}]  }
   0x1   :  { %10 = vsyncpa [#allocation3 + $0x1], 0 }
   0x2   :  { %11 = vsyncpa [#allocation6], 0 }
   0x3   :  { %12 = vsyncpa [#allocation4], 0 }
   0x4   :  { %14 = vsyncpa [#allocation4 + $0x1], 0  ;;  %s1231_s12 = smov 0   ;;  %s1233_s13 = smov 0  }
   0x5   :  { %s1235_s14 = smov 0   ;;  %s1237_s15 = smov 0  }
   0x6   :  { %s1239_s16 = smov 0   ;;  %s1241_s17 = smov 0  }
   0x7 LB: > { %s829_s18 = sadd.s32 4294967295, %s1202_s17   ;;  %s830_s19 = sadd.s32 4294967294, %s1202_s17   ;;  %s1202_s17 = sphi %s1241_s17, %s20_s17   ;;  %s1198_s16 = sphi %s1239_s16, %s1571_s16   ;;  %s1194_s15 = sphi %s1237_s15, %s1570_s15   ;;  %s1190_s14 = sphi %s1235_s14, %s1569_s14   ;;  %s1186_s13 = sphi %s1233_s13, %s1568_s13   ;;  %s1182_s12 = sphi %s1231_s12, %s1567_s12  }
   0x8   : > { %p52_p0 = scmp.ne.s32.totalorder %s1186_s13, %s1182_s12  ;;  %p1265_p1 = scmp.eq.s32.totalorder %s829_s18, 0 }
   0x9   : > { %p1269_p2 = scmp.eq.s32.totalorder %s829_s18, 1  ;;  %p136_p3 = scmp.eq.s32.totalorder %s830_s19, 1 }
   0xa   : > { %p1275_p4 = por %p1265_p1, %p52_p0  ;;  %p831_p5 = scmp.ge.s32.totalorder %s1202_s17, 1 }
   0xb   : > { %p1280_p6 = por %p136_p3, %p52_p0  ;;  %p143_p7 = scmp.lt.s32.totalorder %s1202_s17, 3 }
   0xc   : > { %s1555_s22 = scalar_select %p1275_p4, 1, 0 }
   0xd   : > { %s1556_s23 = scalar_select %p1280_p6, 1, 0 }
   0xe   : > { %p1285_p8 = pnand %p831_p5, %p143_p7  ;;  %s1204_s25 = smov [#allocation5]  }
   0xf   : > { %s157_s26 = sshll.u32 %s1204_s25, 4  ;;  %s32_s28 = sadd.s32 1, %s1198_s16  ;;  %s158_s26 = int_to_ptr.vmem [resolvable:$true] %s157_s26 }
  0x10   : > { %p971_p9 = pneg %p1285_p8  ;;  %s1075_s29 = scalar_lea.vmem %s158_s26, 1024 }
  0x11   : > { %p1076_p13 = scmp.ne.s32.totalorder %s158_s26, %s1075_s29  ;;  %p1083_p5 = scmp.lt.s32.totalorder %s158_s26, %s158_s26 }
  0x12   : > { %p1294_p11 = pnand %p971_p9, %p1265_p1  ;;  %p1084_p7 = scmp.lt.s32.totalorder %s1075_s29, %s1075_s29 }
  0x14   : > { %p1066_p12 = pneg %p1294_p11  ;;  %p1085_p6 = por %p1084_p7, %p1083_p5 }
  0x16   : > { %p1078_p0 = pnand %p1076_p13, %p1066_p12 }
  0x18   : > { %p1079_p3 = pneg %p1078_p0 }
  0x1a   : > { %p1086_p4 = pnand %p1085_p6, %p1079_p3 }
  0x1c   : > { %1089 = shalt.err (!%p1086_p4)
}
  0x1d   : > { %s1551_s30 = smov 64   ;;  %s1552_s4 = smov 4  }
  0x1e   : > { %974 = dma.hbm_to_vmem [thread:$0]  (!%p1294_p11), %s1547_s1, 1024, %s158_s26, [#allocation6], %s1551_s30, %s1551_s30, %s1552_s4  }
  0x1f   : > { %p34_p4 = scmp.ge.s32.totalorder %s32_s28, 2  ;;  %s39_s7 = sadd.s32 1, %s1190_s14 }
  0x20   : > { %p46_p6 = scmp.ne.s32.totalorder %s1190_s14, %s1186_s13  ;;  %p47_p9 = scmp.eq.s32.totalorder %s1202_s17, 0 }
  0x21   : > { %s1573_s28 = smov (%p34_p4, %s32_s28), 0  ;;  %p984_p0 = scmp.lt.s32.totalorder %s1202_s17, 2 }
  0x22   : > { %p1315_p12 = por %p47_p9, %p46_p6  ;;  %p1321_p13 = por %p1269_p2, %p46_p6 }
  0x23   : > { %s36_s10 = ssub.s32 %s1198_s16, %s1573_s28  ;;  %s178_s11 = sand.u32 1, %s1190_s14  }
  0x24   : > { %p37_p11 = scmp.eq.s32.totalorder %s36_s10, 0  ;;  %s835_s18 = sshll.u32 %s178_s11, 7 }
  0x25   : > { %s873_s25 = sshll.u32 %s1198_s16, 11  ;;  %s182_s5 = scalar_lea.vmem [#allocation2], %s835_s18 }
  0x26   : > { %s1330_s19 = scalar_select %p37_p11, %s1190_s14, %s39_s7  }
  0x27   : > { %s188_s29 = scalar_lea.hbm %s1546_s0, %s873_s25  ;;  %s189_s6 = sshll.u32 %s182_s5, 4  ;;  %s190_s6 = int_to_ptr.vmem [resolvable:$true] %s189_s6 }
  0x28   : > { %p1338_p2 = pnand %p984_p0, %p1315_p12  ;;  %s179_s30 = scalar_lea.sflag [#allocation3], %s178_s11 }
  0x29   : > { %s1103_s10 = scalar_lea.vmem %s190_s6, 2048  ;;  %s1207_s7 = smov [#allocation2]  }
  0x2a   : > { %p1092_p3 = pneg %p1338_p2  ;;  %p1104_p5 = scmp.ne.s32.totalorder %s190_s6, %s1103_s10 }
  0x2b   : > { %s1108_s4 = sshll.u32 %s1207_s7, 4  ;;  %s1109_s4 = int_to_ptr.vmem [resolvable:$false] %s1108_s4 }
  0x2c   : > { %p1106_p7 = pnand %p1104_p5, %p1092_p3  ;;  %s1110_s25 = scalar_lea.vmem %s1109_s4, 4096 }
  0x2d   : > { %p1111_p6 = scmp.lt.s32.totalorder %s190_s6, %s1109_s4  ;;  %p1112_p9 = scmp.lt.s32.totalorder %s1110_s25, %s1103_s10 }
  0x2e   : > { %p1107_p4 = pneg %p1106_p7 }
  0x2f   : > { %p1113_p11 = por %p1112_p9, %p1111_p6 }
  0x31   : > { %p1114_p10 = pnand %p1113_p11, %p1107_p4 }
  0x33   : > { %1117 = shalt.err (!%p1114_p10)
}
  0x34   : > { %s1562_s8 = smov 4   ;;  %s1563_s18 = smov 64  }
  0x35   : > { %978 = dma.hbm_to_vmem [thread:$0]  (!%p1338_p2), %s188_s29, 2048, %s190_s6, %s179_s30, %s1563_s18, %s1563_s18, %s1562_s8  }
  0x36   : > { %201 = sbr.rel (%p1285_p8) target bundleno = 336 (0x150), region = 32  ;;  %s1352_s11 = sand.u32 (!%p1285_p8), 1, %s1186_s13  }
  0x37   : > { %s839_s4 = sshll.u32 (!%p1285_p8), %s1352_s11, 7  ;;  %s204_s26 = scalar_lea.sflag (!%p1285_p8), [#allocation3], %s1352_s11 }
  0x38   : > { %s1356_s27 = scalar_lea.vmem (!%p1285_p8), [#allocation2], %s839_s4  ;;  %p1564_p10 = scmp.ne.s32.totalorder (!%p1285_p8), %s1555_s22, 0 }
  0x3b   : > { %1169 = dma.done.wait (%p1564_p10), %s204_s26, 2048  }
  0x3c   : > { %1171 = vsyncadd (%p1564_p10), %s204_s26, 4294965248 }
  0x3d   : > { %1173 = dma.done.wait (%p1265_p1), [#allocation6], 1024  }
  0x3e   : > { %1175 = vsyncadd (%p1265_p1), [#allocation6], 4294966272  ;;  %v1040_v0 = vld [vmem:[#allocation5 + $0x38] sm:$0xff]   ;;  %v1041_v1 = vld [vmem:[#allocation5 + $0x30] sm:$0xff]   ;;  %s841_s24 = sshll.u32 %s1352_s11, 8  ;;  %s874_s6 = sshll.u32 %s1194_s15, 12 }
  0x3f   : > { %899 = vmatprep.subr.bf16.mxu0 %v1040_v0  ;;  %947 = vmatprep.subr.bf16.mxu1 %v1040_v0  ;;  %v1042_v2 = vld [vmem:[#allocation5 + $0x28] sm:$0xff]   ;;  %v1043_v3 = vld [vmem:[#allocation5 + $0x20] sm:$0xff]   ;;  %v1044_v6 = vld [vmem:[#allocation5 + $0x18] sm:$0xff]   ;;  %s1399_s5 = scalar_lea.vmem [#allocation7], %s841_s24  ;;  %s1490_s15 = scalar_lea.hbm %s1549_s3, %s874_s6 }
  0x40   : > { %900 = vmatpush3.bf16.msra.mxu0 %v1040_v0  ;;  %955 = vmatpush3.bf16.msra.mxu1 %v1040_v0  ;;  %v1048_v4 = vld [vmem:[%s1356_s27] sm:$0xff]   ;;  %v1045_v7 = vld [vmem:[#allocation5 + $0x10] sm:$0xff]   ;;  %v1046_v8 = vld [vmem:[#allocation5 + $0x8] sm:$0xff]   ;;  %s719_s21 = sshll.u32 %s1399_s5, 4  ;;  %s705_s25 = scalar_lea.sflag [#allocation4], %s1352_s11  ;;  %s1492_s21 = int_to_ptr.vmem [resolvable:$true] %s719_s21 }
  0x41   : > { %901 = vmatprep.subr.bf16.mxu0 %v1041_v1  ;;  %948 = vmatprep.subr.bf16.mxu1 %v1041_v1  ;;  %v1049_v5 = vld [vmem:[%s1356_s27 + $0x40] sm:$0xff]   ;;  %v1050_v10 = vld [vmem:[%s1356_s27 + $0x8] sm:$0xff]   ;;  %v1052_v12 = vld [vmem:[%s1356_s27 + $0x10] sm:$0xff]   ;;  %s1118_s8 = scalar_lea.vmem %s1492_s21, 4096  ;;  %s1208_s18 = smov [#allocation7]  }
  0x42   : > { %915 = vmatprep.mubr.bf16.mxu0 %v1048_v4  ;;  %931 = vmatprep.mubr.bf16.mxu1 %v1049_v5  ;;  %v1047_v9 = vld [vmem:[#allocation5] sm:$0xff]   ;;  %v1051_v11 = vld [vmem:[%s1356_s27 + $0x48] sm:$0xff]   ;;  %v1053_v13 = vld [vmem:[%s1356_s27 + $0x50] sm:$0xff]   ;;  %p1119_p1 = scmp.ne.s32.totalorder %s1492_s21, %s1118_s8  ;;  %s1122_s4 = sshll.u32 %s1208_s18, 4  ;;  %s1123_s4 = int_to_ptr.vmem [resolvable:$false] %s1122_s4 }
  0x43   : > { %v1054_v14 = vld [vmem:[%s1356_s27 + $0x18] sm:$0xff]   ;;  %v1056_v16 = vld [vmem:[%s1356_s27 + $0x20] sm:$0xff]   ;;  %v1058_v18 = vld [vmem:[%s1356_s27 + $0x28] sm:$0xff]   ;;  %s1124_s26 = scalar_lea.vmem %s1123_s4, 8192  ;;  %p1125_p0 = scmp.lt.s32.totalorder %s1492_s21, %s1123_s4 }
  0x44   : > { %902 = vmatpush3.bf16.msra.mxu0 %v1041_v1  ;;  %956 = vmatpush3.bf16.msra.mxu1 %v1041_v1  ;;  %v1055_v15 = vld [vmem:[%s1356_s27 + $0x58] sm:$0xff]   ;;  %v1057_v17 = vld [vmem:[%s1356_s27 + $0x60] sm:$0xff]   ;;  %v1059_v19 = vld [vmem:[%s1356_s27 + $0x68] sm:$0xff]   ;;  %p1120_p8 = pnand %p1119_p1, %p1321_p13  ;;  %p1126_p2 = scmp.lt.s32.totalorder %s1124_s26, %s1118_s8 }
  0x45   : > { %903 = vmatprep.subr.bf16.mxu0 %v1042_v2  ;;  %949 = vmatprep.subr.bf16.mxu1 %v1042_v2  ;;  %v1060_v20 = vld [vmem:[%s1356_s27 + $0x30] sm:$0xff]   ;;  %v1062_v22 = vld [vmem:[%s1356_s27 + $0x38] sm:$0xff]   ;;  %v1385_v24 = vld [vmem:[%s1548_s2] ss:$0 sm:$0xff] }
  0x46   : > { %v1061_v21 = vld [vmem:[%s1356_s27 + $0x70] sm:$0xff]   ;;  %v1063_v23 = vld [vmem:[%s1356_s27 + $0x78] sm:$0xff]   ;;  %v1391_v26 = vld [vmem:[%s1548_s2 + $0x1] ss:$0 sm:$0xff]  ;;  %p1121_p12 = pneg %p1120_p8  ;;  %p1127_p3 = por %p1126_p2, %p1125_p0 }
  0x48   : > { %904 = vmatpush3.bf16.msra.mxu0 %v1042_v2  ;;  %957 = vmatpush3.bf16.msra.mxu1 %v1042_v2  ;;  %p1128_p5 = pnand %p1127_p3, %p1121_p12 }
  0x49   : > { %905 = vmatprep.subr.bf16.mxu0 %v1043_v3  ;;  %950 = vmatprep.subr.bf16.mxu1 %v1043_v3 }
  0x4c   : > { %906 = vmatpush3.bf16.msra.mxu0 %v1043_v3  ;;  %958 = vmatpush3.bf16.msra.mxu1 %v1043_v3 }
  0x4d   : > { %907 = vmatprep.subr.bf16.mxu0 %v1044_v6  ;;  %951 = vmatprep.subr.bf16.mxu1 %v1044_v6 }
  0x50   : > { %908 = vmatpush3.bf16.msra.mxu0 %v1044_v6  ;;  %959 = vmatpush3.bf16.msra.mxu1 %v1044_v6 }
  0x51   : > { %909 = vmatprep.subr.bf16.mxu0 %v1045_v7  ;;  %952 = vmatprep.subr.bf16.mxu1 %v1045_v7 }
  0x54   : > { %910 = vmatpush3.bf16.msra.mxu0 %v1045_v7  ;;  %960 = vmatpush3.bf16.msra.mxu1 %v1045_v7 }
  0x55   : > { %911 = vmatprep.subr.bf16.mxu0 %v1046_v8  ;;  %953 = vmatprep.subr.bf16.mxu1 %v1046_v8 }
  0x58   : > { %912 = vmatpush3.bf16.msra.mxu0 %v1046_v8  ;;  %961 = vmatpush3.bf16.msra.mxu1 %v1046_v8 }
  0x59   : > { %913 = vmatprep.subr.bf16.mxu0 %v1047_v9  ;;  %954 = vmatprep.subr.bf16.mxu1 %v1047_v9 }
  0x5c   : > { %914 = vmatpush3.bf16.msra.mxu0 %v1047_v9  ;;  %962 = vmatpush3.bf16.msra.mxu1 %v1047_v9 }
  0x5f   : > { %916 = vmatmul.mubr.bf16.vlgmr.msra.gmra.mxu0 %v1050_v10  ;;  %932 = vmatmul.mubr.bf16.vlgmr.msra.gmra.mxu1 %v1051_v11 }
  0x60   : > { %919 = vmatprep.mubr.bf16.mxu0 %v1052_v12  ;;  %935 = vmatprep.mubr.bf16.mxu1 %v1053_v13 }
  0x67   : > { %920 = vmatmul.mubr.bf16.gmra.mxu0 %v1054_v14  ;;  %936 = vmatmul.mubr.bf16.gmra.mxu1 %v1055_v15 }
  0x68   : > { %923 = vmatprep.mubr.bf16.mxu0 %v1056_v16  ;;  %939 = vmatprep.mubr.bf16.mxu1 %v1057_v17 }
  0x6f   : > { %924 = vmatmul.mubr.bf16.gmra.mxu0 %v1058_v18  ;;  %940 = vmatmul.mubr.bf16.gmra.mxu1 %v1059_v19 }
  0x70   : > { %927 = vmatprep.mubr.bf16.mxu0 %v1060_v20  ;;  %943 = vmatprep.mubr.bf16.mxu1 %v1061_v21 }
  0x77   : > { %928 = vmatmul.mubr.bf16.gmra.mxu0 %v1062_v22  ;;  %944 = vmatmul.mubr.bf16.gmra.mxu1 %v1063_v23 }
 0x11f   : > { %v917_v25 = vpop.f32.mrf.mxu0  ;;  %v933_v27 = vpop.f32.mrf.mxu1 }
 0x120   : > { %v605_v28 = vmul.f32 %v917_v25, %v1385_v24  ;;  %v621_v29 = vmul.f32 %v933_v27, %v1385_v24 }
 0x121   : > { %v471_v30 = vpop.f32.mrf.mxu0  ;;  %v535_v31 = vpop.f32.mrf.mxu1 }
 0x122   : > { %v642_v32 = vadd.f32 %v1391_v26, %v605_v28  ;;  %v658_v33 = vadd.f32 %v1391_v26, %v621_v29  ;;  %v603_v34 = vmul.f32 %v1385_v24, %v471_v30  ;;  %v619_v35 = vmul.f32 %v1385_v24, %v535_v31 }
 0x123   : > { %v918_v36 = vpop.f32.mrf.mxu0  ;;  %v934_v37 = vpop.f32.mrf.mxu1 }
 0x124   : > { %674 = vst [vmem:[%s1399_s5 + $0x10] sm:$0xff] %v642_v32  ;;  %690 = vst [vmem:[%s1399_s5 + $0x90] sm:$0xff] %v658_v33  ;;  %v640_v38 = vadd.f32 %v1391_v26, %v603_v34  ;;  %v656_v39 = vadd.f32 %v1391_v26, %v619_v35  ;;  %v606_v40 = vmul.f32 %v918_v36, %v1385_v24 }
 0x125   : > { %v622_v41 = vmul.f32 %v934_v37, %v1385_v24  ;;  %v474_v42 = vpop.f32.mrf.mxu0  ;;  %v538_v43 = vpop.f32.mrf.mxu1 }
 0x126   : > { %672 = vst [vmem:[%s1399_s5] sm:$0xff] %v640_v38  ;;  %688 = vst [vmem:[%s1399_s5 + $0x80] sm:$0xff] %v656_v39  ;;  %v643_v44 = vadd.f32 %v1391_v26, %v606_v40  ;;  %v604_v46 = vmul.f32 %v1385_v24, %v474_v42  ;;  %v620_v47 = vmul.f32 %v1385_v24, %v538_v43 }
 0x127   : > { %v659_v45 = vadd.f32 %v1391_v26, %v622_v41  ;;  %v921_v48 = vpop.f32.mrf.mxu0  ;;  %v937_v49 = vpop.f32.mrf.mxu1 }
 0x128   : > { %675 = vst [vmem:[%s1399_s5 + $0x18] sm:$0xff] %v643_v44  ;;  %v641_v50 = vadd.f32 %v1391_v26, %v604_v46  ;;  %v657_v51 = vadd.f32 %v1391_v26, %v620_v47  ;;  %v609_v52 = vmul.f32 %v921_v48, %v1385_v24  ;;  %v625_v53 = vmul.f32 %v937_v49, %v1385_v24 }
 0x129   : > { %691 = vst [vmem:[%s1399_s5 + $0x98] sm:$0xff] %v659_v45  ;;  %v487_v54 = vpop.f32.mrf.mxu0  ;;  %v551_v55 = vpop.f32.mrf.mxu1 }
 0x12a   : > { %673 = vst [vmem:[%s1399_s5 + $0x8] sm:$0xff] %v641_v50  ;;  %689 = vst [vmem:[%s1399_s5 + $0x88] sm:$0xff] %v657_v51  ;;  %v646_v56 = vadd.f32 %v1391_v26, %v609_v52  ;;  %v662_v57 = vadd.f32 %v1391_v26, %v625_v53  ;;  %v607_v58 = vmul.f32 %v1385_v24, %v487_v54 }
 0x12b   : > { %v623_v59 = vmul.f32 %v1385_v24, %v551_v55  ;;  %v922_v60 = vpop.f32.mrf.mxu0  ;;  %v938_v61 = vpop.f32.mrf.mxu1 }
 0x12c   : > { %678 = vst [vmem:[%s1399_s5 + $0x30] sm:$0xff] %v646_v56  ;;  %694 = vst [vmem:[%s1399_s5 + $0xb0] sm:$0xff] %v662_v57  ;;  %v644_v62 = vadd.f32 %v1391_v26, %v607_v58  ;;  %v610_v0 = vmul.f32 %v922_v60, %v1385_v24  ;;  %v626_v1 = vmul.f32 %v938_v61, %v1385_v24 }
 0x12d   : > { %v660_v63 = vadd.f32 %v1391_v26, %v623_v59  ;;  %v490_v2 = vpop.f32.mrf.mxu0  ;;  %v554_v3 = vpop.f32.mrf.mxu1 }
 0x12e   : > { %676 = vst [vmem:[%s1399_s5 + $0x20] sm:$0xff] %v644_v62  ;;  %v647_v4 = vadd.f32 %v1391_v26, %v610_v0  ;;  %v663_v5 = vadd.f32 %v1391_v26, %v626_v1  ;;  %v608_v6 = vmul.f32 %v1385_v24, %v490_v2  ;;  %v624_v7 = vmul.f32 %v1385_v24, %v554_v3 }
 0x12f   : > { %692 = vst [vmem:[%s1399_s5 + $0xa0] sm:$0xff] %v660_v63  ;;  %v925_v8 = vpop.f32.mrf.mxu0  ;;  %v941_v9 = vpop.f32.mrf.mxu1 }
 0x130   : > { %679 = vst [vmem:[%s1399_s5 + $0x38] sm:$0xff] %v647_v4  ;;  %695 = vst [vmem:[%s1399_s5 + $0xb8] sm:$0xff] %v663_v5  ;;  %v645_v10 = vadd.f32 %v1391_v26, %v608_v6  ;;  %v661_v11 = vadd.f32 %v1391_v26, %v624_v7  ;;  %v613_v12 = vmul.f32 %v925_v8, %v1385_v24 }
 0x131   : > { %v629_v13 = vmul.f32 %v941_v9, %v1385_v24  ;;  %v503_v14 = vpop.f32.mrf.mxu0  ;;  %v567_v15 = vpop.f32.mrf.mxu1 }
 0x132   : > { %677 = vst [vmem:[%s1399_s5 + $0x28] sm:$0xff] %v645_v10  ;;  %693 = vst [vmem:[%s1399_s5 + $0xa8] sm:$0xff] %v661_v11  ;;  %v650_v16 = vadd.f32 %v1391_v26, %v613_v12  ;;  %v611_v18 = vmul.f32 %v1385_v24, %v503_v14  ;;  %v627_v19 = vmul.f32 %v1385_v24, %v567_v15 }
 0x133   : > { %v666_v17 = vadd.f32 %v1391_v26, %v629_v13  ;;  %v926_v20 = vpop.f32.mrf.mxu0  ;;  %v942_v21 = vpop.f32.mrf.mxu1 }
 0x134   : > { %682 = vst [vmem:[%s1399_s5 + $0x50] sm:$0xff] %v650_v16  ;;  %v648_v22 = vadd.f32 %v1391_v26, %v611_v18  ;;  %v664_v23 = vadd.f32 %v1391_v26, %v627_v19  ;;  %v614_v25 = vmul.f32 %v926_v20, %v1385_v24  ;;  %v630_v27 = vmul.f32 %v942_v21, %v1385_v24 }
 0x135   : > { %698 = vst [vmem:[%s1399_s5 + $0xd0] sm:$0xff] %v666_v17  ;;  %v506_v28 = vpop.f32.mrf.mxu0  ;;  %v570_v29 = vpop.f32.mrf.mxu1 }
 0x136   : > { %680 = vst [vmem:[%s1399_s5 + $0x40] sm:$0xff] %v648_v22  ;;  %696 = vst [vmem:[%s1399_s5 + $0xc0] sm:$0xff] %v664_v23  ;;  %v651_v30 = vadd.f32 %v1391_v26, %v614_v25  ;;  %v667_v31 = vadd.f32 %v1391_v26, %v630_v27  ;;  %v612_v32 = vmul.f32 %v1385_v24, %v506_v28 }
 0x137   : > { %v628_v33 = vmul.f32 %v1385_v24, %v570_v29  ;;  %v929_v34 = vpop.f32.mrf.mxu0  ;;  %v945_v35 = vpop.f32.mrf.mxu1 }
 0x138   : > { %683 = vst [vmem:[%s1399_s5 + $0x58] sm:$0xff] %v651_v30  ;;  %699 = vst [vmem:[%s1399_s5 + $0xd8] sm:$0xff] %v667_v31  ;;  %v649_v36 = vadd.f32 %v1391_v26, %v612_v32  ;;  %v617_v38 = vmul.f32 %v929_v34, %v1385_v24  ;;  %v633_v39 = vmul.f32 %v945_v35, %v1385_v24 }
 0x139   : > { %v665_v37 = vadd.f32 %v1391_v26, %v628_v33  ;;  %v519_v40 = vpop.f32.mrf.mxu0  ;;  %v583_v41 = vpop.f32.mrf.mxu1 }
 0x13a   : > { %681 = vst [vmem:[%s1399_s5 + $0x48] sm:$0xff] %v649_v36  ;;  %v654_v42 = vadd.f32 %v1391_v26, %v617_v38  ;;  %v670_v43 = vadd.f32 %v1391_v26, %v633_v39  ;;  %v615_v44 = vmul.f32 %v1385_v24, %v519_v40  ;;  %v631_v45 = vmul.f32 %v1385_v24, %v583_v41 }
 0x13b   : > { %697 = vst [vmem:[%s1399_s5 + $0xc8] sm:$0xff] %v665_v37  ;;  %v930_v46 = vpop.f32.mrf.mxu0  ;;  %v946_v47 = vpop.f32.mrf.mxu1 }
 0x13c   : > { %686 = vst [vmem:[%s1399_s5 + $0x70] sm:$0xff] %v654_v42  ;;  %702 = vst [vmem:[%s1399_s5 + $0xf0] sm:$0xff] %v670_v43  ;;  %v652_v48 = vadd.f32 %v1391_v26, %v615_v44  ;;  %v668_v49 = vadd.f32 %v1391_v26, %v631_v45  ;;  %v618_v50 = vmul.f32 %v930_v46, %v1385_v24 }
 0x13d   : > { %v634_v51 = vmul.f32 %v946_v47, %v1385_v24  ;;  %v522_v52 = vpop.f32.mrf.mxu0  ;;  %v586_v53 = vpop.f32.mrf.mxu1 }
 0x13e   : > { %684 = vst [vmem:[%s1399_s5 + $0x60] sm:$0xff] %v652_v48  ;;  %700 = vst [vmem:[%s1399_s5 + $0xe0] sm:$0xff] %v668_v49  ;;  %v655_v54 = vadd.f32 %v1391_v26, %v618_v50  ;;  %v616_v56 = vmul.f32 %v1385_v24, %v522_v52  ;;  %v632_v57 = vmul.f32 %v1385_v24, %v586_v53 }
 0x13f   : > { %v671_v55 = vadd.f32 %v1391_v26, %v634_v51 }
 0x140   : > { %687 = vst [vmem:[%s1399_s5 + $0x78] sm:$0xff] %v655_v54  ;;  %v653_v58 = vadd.f32 %v1391_v26, %v616_v56  ;;  %v669_v59 = vadd.f32 %v1391_v26, %v632_v57 }
 0x141   : > { %703 = vst [vmem:[%s1399_s5 + $0xf8] sm:$0xff] %v671_v55 }
 0x142   : > { %685 = vst [vmem:[%s1399_s5 + $0x68] sm:$0xff] %v653_v58  ;;  %701 = vst [vmem:[%s1399_s5 + $0xe8] sm:$0xff] %v669_v59 }
 0x143   : > { %1131 = shalt.err (!%p1128_p5)
}
 0x144   : > { %s1132_s27 = scalar_lea.hbm %s1490_s15, 4096  ;;  %s1136_s24 = scalar_lea.hbm %s1549_s3, 8192 }
 0x145   : > { %p1133_p7 = scmp.ne.s32.totalorder %s1490_s15, %s1132_s27  ;;  %p1137_p9 = scmp.lt.s32.totalorder %s1490_s15, %s1549_s3 }
 0x146   : > { %p1138_p11 = scmp.lt.s32.totalorder %s1136_s24, %s1132_s27 }
 0x147   : > { %p1134_p4 = pnand %p1133_p7, %p1321_p13 }
 0x148   : > { %p1139_p10 = por %p1138_p11, %p1137_p9 }
 0x149   : > { %p1135_p6 = pneg %p1134_p4 }
 0x14b   : > { %p1140_p1 = pnand %p1139_p10, %p1135_p6 }
 0x14d   : > { %1143 = shalt.err (!%p1140_p1)
}
 0x14e   : > { %s1209_s5 = smov 128   ;;  %s1210_s6 = smov 8  }
 0x14f   : > { %969 = dma.vmem_to_hbm [thread:$0]  (%p1321_p13), %s1492_s21, 4096, %s1490_s15, %s705_s25, %s1209_s5, %s1209_s5, %s1210_s6  }
 0x150 PF: > { %s734_s10 = sand.u32 1, %s1182_s12   ;;  %p1565_p8 = scmp.ne.s32.totalorder %s1556_s23, 0 }
 0x151   : > { %p1566_p12 = scmp.ge.s32.totalorder %s1202_s17, 2  ;;  %s735_s7 = scalar_lea.sflag [#allocation4], %s734_s10 }
 0x153   : > { %p980_p0 = pnand %p1566_p12, %p1565_p8 }
 0x155   : > { %p981_p2 = pneg %p980_p0 }
 0x157   : > { %1177 = dma.done.wait (%p981_p2), %s735_s7, 4096  }
 0x158   : > { %1179 = vsyncadd (%p981_p2), %s735_s7, 4294963200  ;;  %s20_s17 = sadd.s32 1, %s1202_s17   ;;  %s1567_s12 = smov %s1186_s13 }
 0x159   : > { %p17_p3 = scmp.ge.s32.totalorder %s20_s17, 4   ;;  %s1568_s13 = smov %s1190_s14 }
 0x15a   : > { %s1569_s14 = smov %s1330_s19  ;;  %s1570_s15 = smov %s1198_s16 }
 0x15b   : > { %s1571_s16 = smov %s1573_s28  ;;  %19 = sbr.rel (!%p17_p3) target bundleno = 7 (0x7), region = 85 }
 0x160   :  { %740 = vsyncpa [#allocation3], 1 }
 0x161   :  { %742 = vsyncpa [#allocation3 + $0x1], 1 }
 0x162   :  { %743 = vsyncpa [#allocation6], 1 }
 0x163   :  { %744 = vsyncpa [#allocation4], 1 }
 0x164   :  { %746 = vsyncpa [#allocation4 + $0x1], 1 }

</bundles_post_ra>
